<compile_context>
chip_gen: v7x
topology: tpu7x:2x2x1
jax: 0.10.0
libtpu: 0.0.40
codegen_flags: <defaults>
</compile_context>

<pallas_src>
import functools

import jax
import jax.numpy as jnp
from jax.experimental import pallas as pl
from jax.experimental.pallas import tpu as pltpu


# ----------------------------- Pallas kernel ------------------------------


def _policy_kernel(x_ref, w1_ref, b1_ref, w2_ref, b2_ref, wh_ref, bh_ref,
                   out_ref, *, a_size, packed, small_s):
    x = x_ref[...]                                                  # [Tb, S] f32

    if small_s:
        # K = S is tiny (e.g. 2): a rank-S VPU broadcast-mul/add beats a
        # nearly-empty MXU pass on the critical path.  w1 is stored f32 here.
        w1 = w1_ref[...].astype(jnp.float32)                        # [S, Hp]
        h1 = x[:, 0:1] * w1[0:1, :]
        for i in range(1, x.shape[1]):
            h1 = h1 + x[:, i:i + 1] * w1[i:i + 1, :]
    else:
        h1 = jnp.dot(x.astype(jnp.bfloat16), w1_ref[...],
                     preferred_element_type=jnp.float32)
    h1 = jnp.maximum(h1 + b1_ref[...], 0.0)                         # [Tb, Hp] f32

    h2 = jnp.dot(h1.astype(jnp.bfloat16), w2_ref[...],
                 preferred_element_type=jnp.float32)
    h2 = jnp.maximum(h2 + b2_ref[...], 0.0)                         # [Tb, Hp] f32

    head = jnp.dot(h2.astype(jnp.bfloat16), wh_ref[...],
                   preferred_element_type=jnp.float32) + bh_ref[...]

    if packed:
        # mu in lanes [0, A), log_std in lanes [A, 2A) of one 128-lane block.
        lane = jax.lax.broadcasted_iota(jnp.int32, head.shape, 1)
        std_branch = jnp.exp(jnp.clip(head, -20.0, 2.0))            # EUP op
        out_ref[...] = jnp.where(lane >= a_size, std_branch, head)
    else:
        # split is a multiple of 128 -> tile-aligned static slices / stores.
        split = head.shape[-1] // 2
        out_ref[:, :split] = head[:, :split]
        out_ref[:, split:] = jnp.exp(jnp.clip(head[:, split:], -20.0, 2.0))


# ------------------------------- wrapper -----------------------------------


def _round_up(x, m):
    return ((x + m - 1) // m) * m


def _pad_to(x, rows, cols):
    r, c = x.shape
    return jnp.pad(x, ((0, rows - r), (0, cols - c)))


def prepare_padded_params(params):
    """Pad / fuse / downcast parameters ONCE (off the per-call hot path).

    Weights are stored as (in, out) = transpose of PyTorch's (out, in).
    Matmul weights are bf16 (f32 accumulation in-kernel); biases stay f32.
    """
    w1, b1 = params["w1"], params["b1"]
    w2, b2 = params["w2"], params["b2"]
    wmu, bmu = params["wmu"], params["bmu"]
    wls, bls = params["wls"], params["bls"]

    S, H = w1.shape
    A = wmu.shape[1]
    Hp = _round_up(H, 128)
    small_s = S < 8
    packed = (2 * A) <= 128

    # Layer 1: S left unpadded (full-dim block is legal).  Kept f32 when the
    # kernel uses the VPU rank-S path; bf16 otherwise.
    w1_dtype = jnp.float32 if small_s else jnp.bfloat16
    w1_p = _pad_to(w1.astype(jnp.float32), S, Hp).astype(w1_dtype)
    b1_p = _pad_to(b1.reshape(1, -1).astype(jnp.float32), 1, Hp)

    w2_p = _pad_to(w2.astype(jnp.float32), Hp, Hp).astype(jnp.bfloat16)
    b2_p = _pad_to(b2.reshape(1, -1).astype(jnp.float32), 1, Hp)

    if packed:
        # Single 128-lane head block: mu lanes [0,A), log_std lanes [A,2A).
        Ap2 = 128
        wh = jnp.zeros((Hp, Ap2), jnp.float32)
        wh = wh.at[:H, :A].set(wmu.astype(jnp.float32))
        wh = wh.at[:H, A:2 * A].set(wls.astype(jnp.float32))
        bh = jnp.zeros((1, Ap2), jnp.float32)
        bh = bh.at[0, :A].set(bmu.astype(jnp.float32))
        bh = bh.at[0, A:2 * A].set(bls.astype(jnp.float32))
    else:
        Ap = _round_up(A, 128)
        Ap2 = 2 * Ap
        wh = jnp.concatenate(
            [_pad_to(wmu.astype(jnp.float32), Hp, Ap),
             _pad_to(wls.astype(jnp.float32), Hp, Ap)], axis=1)
        bh = jnp.concatenate(
            [_pad_to(bmu.reshape(1, -1).astype(jnp.float32), 1, Ap),
             _pad_to(bls.reshape(1, -1).astype(jnp.float32), 1, Ap)], axis=1)

    return {"w1": w1_p, "b1": b1_p, "w2": w2_p, "b2": b2_p,
            "wh": wh.astype(jnp.bfloat16), "bh": bh,
            "S": S, "H": H, "A": A, "Hp": Hp, "Ap2": Ap2, "packed": packed}


@functools.partial(jax.jit, static_argnames=("a_size",))
def _policy_forward_padded(x_p, w1_p, b1_p, w2_p, b2_p, wh_p, bh_p, *, a_size):
    Bp, S = x_p.shape
    Hp = w2_p.shape[0]
    Ap2 = wh_p.shape[1]

    # Batch tiling: single block for tiny batches; otherwise >= 2 parallel grid
    # steps (v7x megacore), with tiles up to 512 rows to amortize step overhead.
    if Bp <= 32:
        tile_b = Bp
    else:
        tile_b = min(512, Bp // 2)
    grid = (Bp // tile_b,)

    packed = (2 * a_size) <= 128
    small_s = S < 8
    kernel = functools.partial(_policy_kernel, a_size=a_size, packed=packed,
                               small_s=small_s)

    rep = lambda i: (0, 0)   # weights / biases: same block for every grid step

    out = pl.pallas_call(
        kernel,
        out_shape=jax.ShapeDtypeStruct((Bp, Ap2), jnp.float32),
        grid=grid,
        in_specs=[
            pl.BlockSpec((tile_b, S), lambda i: (i, 0)),
            pl.BlockSpec((S, Hp), rep),
            pl.BlockSpec((1, Hp), rep),
            pl.BlockSpec((Hp, Hp), rep),
            pl.BlockSpec((1, Hp), rep),
            pl.BlockSpec((Hp, Ap2), rep),
            pl.BlockSpec((1, Ap2), rep),
        ],
        out_specs=pl.BlockSpec((tile_b, Ap2), lambda i: (i, 0)),
        compiler_params=pltpu.CompilerParams(
            dimension_semantics=("parallel",)),
    )(x_p, w1_p, b1_p, w2_p, b2_p, wh_p, bh_p)
    return out


def policy_forward(states, padded):
    """Returns (mu, std) of the Normal produced by PolicyNetwork.forward."""
    B, S = states.shape
    assert S == padded["S"]
    A, Ap2, packed = padded["A"], padded["Ap2"], padded["packed"]

    # Bucket the padded batch size to cap recompiles when B varies.
    if B <= 1024:
        Bp = max(8, pl.next_power_of_2(B))
    else:
        Bp = _round_up(B, 1024)

    x_p = jnp.pad(states.astype(jnp.float32), ((0, Bp - B), (0, 0)))

    out = _policy_forward_padded(x_p, padded["w1"], padded["b1"],
                                 padded["w2"], padded["b2"],
                                 padded["wh"], padded["bh"], a_size=A)
    mu = out[:B, :A]
    if packed:
        std = out[:B, A:2 * A]
    else:
        Ap = Ap2 // 2
        std = out[:B, Ap:Ap + A]
    return mu, std


# -------------------------- parameter construction -------------------------


def init_params(key, n_states, n_actions, n_hidden):
    """Matches PolicyNetwork.__init__: hidden1/hidden2 He-normal, heads Xavier
    uniform, biases zero.  Weights stored as (in, out)."""
    k1, k2, k3, k4 = jax.random.split(key, 4)

    def he_normal(k, fan_in, fan_out):
        std = (2.0 / fan_in) ** 0.5
        return std * jax.random.normal(k, (fan_in, fan_out), dtype=jnp.float32)

    def xavier_uniform(k, fan_in, fan_out):
        limit = (6.0 / (fan_in + fan_out)) ** 0.5
        return jax.random.uniform(k, (fan_in, fan_out), dtype=jnp.float32,
                                  minval=-limit, maxval=limit)

    return {
        "w1": he_normal(k1, n_states, n_hidden),
        "b1": jnp.zeros((n_hidden,), jnp.float32),
        "w2": he_normal(k2, n_hidden, n_hidden),
        "b2": jnp.zeros((n_hidden,), jnp.float32),
        "wmu": xavier_uniform(k3, n_hidden, n_actions),
        "bmu": jnp.zeros((n_actions,), jnp.float32),
        "wls": xavier_uniform(k4, n_hidden, n_actions),
        "bls": jnp.zeros((n_actions,), jnp.float32),
    }


def reference_forward(states, p):
    h1 = jax.nn.relu(states @ p["w1"] + p["b1"])
    h2 = jax.nn.relu(h1 @ p["w2"] + p["b2"])
    mu = h2 @ p["wmu"] + p["bmu"]
    std = jnp.exp(jnp.clip(h2 @ p["wls"] + p["bls"], -20.0, 2.0))
    return mu, std


# --------------------------------- main -------------------------------------


if __name__ == "__main__":
    # MountainCarContinuous-like dims (n_states=2, n_actions=1), small hidden.
    batch, n_states, n_actions, n_hidden = 4, 2, 1, 32

    key = jax.random.PRNGKey(0)
    k_params, k_states, k_states2 = jax.random.split(key, 3)

    params = init_params(k_params, n_states, n_actions, n_hidden)
    padded = prepare_padded_params(params)          # one-time, off the hot path
    states = jax.random.normal(k_states, (batch, n_states), dtype=jnp.float32)

    mu, std = policy_forward(states, padded)
    jax.block_until_ready((mu, std))

    mu_ref, std_ref = reference_forward(states, params)
    assert mu.shape == (batch, n_actions) and std.shape == (batch, n_actions)
    # bf16 matmul operands (f32 accumulation) -> relaxed tolerance vs f32 ref.
    assert jnp.allclose(mu, mu_ref, atol=2e-2, rtol=2e-2)
    assert jnp.allclose(std, std_ref, atol=2e-2, rtol=2e-2)

    # Larger batch exercises the multi-step parallel grid path.
    states_l = jax.random.normal(k_states2, (100, n_states), dtype=jnp.float32)
    mu_l, std_l = policy_forward(states_l, padded)
    jax.block_until_ready((mu_l, std_l))
    mu_lr, std_lr = reference_forward(states_l, params)
    assert jnp.allclose(mu_l, mu_lr, atol=2e-2, rtol=2e-2)
    assert jnp.allclose(std_l, std_lr, atol=2e-2, rtol=2e-2)

    # TODO(synk): sample_or_likelihood's rsample / tanh-squashed log_prob is left
    # to the host/JAX side since the forward() under test returns dist params.
    print("KERNEL_OK")
</pallas_src>

<mosaic_0001>
module attributes {stable_mosaic.version = 11 : i64} {
  func.func @_policy_kernel(%arg0: i32, %arg1: memref<8x2xf32, #tpu.memory_space<vmem>>, %arg2: memref<2x128xf32, #tpu.memory_space<vmem>>, %arg3: memref<1x128xf32, #tpu.memory_space<vmem>>, %arg4: memref<128x128xbf16, #tpu.memory_space<vmem>>, %arg5: memref<1x128xf32, #tpu.memory_space<vmem>>, %arg6: memref<128x128xbf16, #tpu.memory_space<vmem>>, %arg7: memref<1x128xf32, #tpu.memory_space<vmem>>, %arg8: memref<8x128xf32, #tpu.memory_space<vmem>>) attributes {dimension_semantics = [#tpu.dimension_semantics<parallel>], iteration_bounds = array<i64: 1>, scalar_prefetch = 0 : i64, scratch_operands = 0 : i64, tpu.core_type = #tpu.core_type<tc>, window_params = [{transform_indices = @transform_0, window_bounds = array<i64: 8, 2>}, {pipeline_mode = #tpu.pipeline_mode<synchronous>, transform_indices = @transform_1, window_bounds = array<i64: 2, 128>}, {pipeline_mode = #tpu.pipeline_mode<synchronous>, transform_indices = @transform_2, window_bounds = array<i64: 1, 128>}, {pipeline_mode = #tpu.pipeline_mode<synchronous>, transform_indices = @transform_3, window_bounds = array<i64: 128, 128>}, {pipeline_mode = #tpu.pipeline_mode<synchronous>, transform_indices = @transform_4, window_bounds = array<i64: 1, 128>}, {pipeline_mode = #tpu.pipeline_mode<synchronous>, transform_indices = @transform_5, window_bounds = array<i64: 128, 128>}, {pipeline_mode = #tpu.pipeline_mode<synchronous>, transform_indices = @transform_6, window_bounds = array<i64: 1, 128>}, {transform_indices = @transform_7, window_bounds = array<i64: 8, 128>}]} {
    %c0 = arith.constant 0 : index
    %c0_0 = arith.constant 0 : index
    %0 = vector.load %arg1[%c0, %c0_0] : memref<8x2xf32, #tpu.memory_space<vmem>>, vector<8x2xf32>
    %c0_1 = arith.constant 0 : index
    %c0_2 = arith.constant 0 : index
    %1 = vector.load %arg2[%c0_1, %c0_2] : memref<2x128xf32, #tpu.memory_space<vmem>>, vector<2x128xf32>
    %2 = vector.extract_strided_slice %0 {offsets = [0, 0], sizes = [8, 1], strides = [1, 1]} : vector<8x2xf32> to vector<8x1xf32>
    %3 = vector.extract_strided_slice %1 {offsets = [0, 0], sizes = [1, 128], strides = [1, 1]} : vector<2x128xf32> to vector<1x128xf32>
    %4 = vector.broadcast %2 : vector<8x1xf32> to vector<8x128xf32>
    %5 = vector.broadcast %3 : vector<1x128xf32> to vector<8x128xf32>
    %6 = arith.mulf %4, %5 : vector<8x128xf32>
    %7 = vector.extract_strided_slice %0 {offsets = [0, 1], sizes = [8, 1], strides = [1, 1]} : vector<8x2xf32> to vector<8x1xf32>
    %8 = vector.extract_strided_slice %1 {offsets = [1, 0], sizes = [1, 128], strides = [1, 1]} : vector<2x128xf32> to vector<1x128xf32>
    %9 = vector.broadcast %7 : vector<8x1xf32> to vector<8x128xf32>
    %10 = vector.broadcast %8 : vector<1x128xf32> to vector<8x128xf32>
    %11 = arith.mulf %9, %10 : vector<8x128xf32>
    %12 = arith.addf %6, %11 : vector<8x128xf32>
    %c0_3 = arith.constant 0 : index
    %c0_4 = arith.constant 0 : index
    %13 = vector.load %arg3[%c0_3, %c0_4] : memref<1x128xf32, #tpu.memory_space<vmem>>, vector<1x128xf32>
    %14 = vector.broadcast %13 : vector<1x128xf32> to vector<8x128xf32>
    %15 = arith.addf %12, %14 : vector<8x128xf32>
    %cst = arith.constant 0.000000e+00 : f32
    %16 = vector.broadcast %cst : f32 to vector<8x128xf32>
    %17 = arith.maximumf %15, %16 : vector<8x128xf32>
    %18 = arith.truncf %17 : vector<8x128xf32> to vector<8x128xbf16>
    %c0_5 = arith.constant 0 : index
    %c0_6 = arith.constant 0 : index
    %19 = vector.load %arg4[%c0_5, %c0_6] : memref<128x128xbf16, #tpu.memory_space<vmem>>, vector<128x128xbf16>
    %cst_7 = arith.constant dense<0.000000e+00> : vector<8x128xf32>
    %20 = tpu.matmul %18, %19, %cst_7 {dimension_numbers = #tpu.dot_dimension_numbers<[1], [0], [0], [1], [0, 0, 1, 1], [], []>} : vector<8x128xbf16>, vector<128x128xbf16>, vector<8x128xf32> -> vector<8x128xf32>
    %c0_8 = arith.constant 0 : index
    %c0_9 = arith.constant 0 : index
    %21 = vector.load %arg5[%c0_8, %c0_9] : memref<1x128xf32, #tpu.memory_space<vmem>>, vector<1x128xf32>
    %22 = vector.broadcast %21 : vector<1x128xf32> to vector<8x128xf32>
    %23 = arith.addf %20, %22 : vector<8x128xf32>
    %cst_10 = arith.constant 0.000000e+00 : f32
    %24 = vector.broadcast %cst_10 : f32 to vector<8x128xf32>
    %25 = arith.maximumf %23, %24 : vector<8x128xf32>
    %26 = arith.truncf %25 : vector<8x128xf32> to vector<8x128xbf16>
    %c0_11 = arith.constant 0 : index
    %c0_12 = arith.constant 0 : index
    %27 = vector.load %arg6[%c0_11, %c0_12] : memref<128x128xbf16, #tpu.memory_space<vmem>>, vector<128x128xbf16>
    %cst_13 = arith.constant dense<0.000000e+00> : vector<8x128xf32>
    %28 = tpu.matmul %26, %27, %cst_13 {dimension_numbers = #tpu.dot_dimension_numbers<[1], [0], [0], [1], [0, 0, 1, 1], [], []>} : vector<8x128xbf16>, vector<128x128xbf16>, vector<8x128xf32> -> vector<8x128xf32>
    %c0_14 = arith.constant 0 : index
    %c0_15 = arith.constant 0 : index
    %29 = vector.load %arg7[%c0_14, %c0_15] : memref<1x128xf32, #tpu.memory_space<vmem>>, vector<1x128xf32>
    %30 = vector.broadcast %29 : vector<1x128xf32> to vector<8x128xf32>
    %31 = arith.addf %28, %30 : vector<8x128xf32>
    %32 = tpu.iota {dimensions = array<i32: 1>} : vector<8x128xi32>
    %cst_16 = arith.constant -2.000000e+01 : f32
    %cst_17 = arith.constant 2.000000e+00 : f32
    %33 = vector.broadcast %cst_16 : f32 to vector<8x128xf32>
    %34 = arith.maximumf %33, %31 : vector<8x128xf32>
    %35 = vector.broadcast %cst_17 : f32 to vector<8x128xf32>
    %36 = arith.minimumf %35, %34 : vector<8x128xf32>
    %37 = math.exp %36 : vector<8x128xf32>
    %c1_i32 = arith.constant 1 : i32
    %38 = vector.broadcast %c1_i32 : i32 to vector<8x128xi32>
    %39 = arith.cmpi sge, %32, %38 : vector<8x128xi32>
    %40 = arith.select %39, %37, %31 : vector<8x128xi1>, vector<8x128xf32>
    %c0_18 = arith.constant 0 : index
    %c0_19 = arith.constant 0 : index
    %41 = vector.load %arg8[%c0_18, %c0_19] : memref<8x128xf32, #tpu.memory_space<vmem>>, vector<8x128xf32>
    tpu.vector_store %arg8[%c0_18, %c0_19], %40 {strides = array<i32>} : memref<8x128xf32, #tpu.memory_space<vmem>>, vector<8x128xf32>,
    return
  }
  func.func @transform_0(%arg0: i32) -> (i32, i32) {
    %c0_i32 = arith.constant 0 : i32
    %c0_i32_0 = arith.constant 0 : i32
    return %arg0, %c0_i32 : i32, i32
  }
  func.func @transform_1(%arg0: i32) -> (i32, i32) {
    %c0_i32 = arith.constant 0 : i32
    %c0_i32_0 = arith.constant 0 : i32
    %c0_i32_1 = arith.constant 0 : i32
    return %c0_i32, %c0_i32_0 : i32, i32
  }
  func.func @transform_2(%arg0: i32) -> (i32, i32) {
    %c0_i32 = arith.constant 0 : i32
    %c0_i32_0 = arith.constant 0 : i32
    %c0_i32_1 = arith.constant 0 : i32
    return %c0_i32, %c0_i32_0 : i32, i32
  }
  func.func @transform_3(%arg0: i32) -> (i32, i32) {
    %c0_i32 = arith.constant 0 : i32
    %c0_i32_0 = arith.constant 0 : i32
    %c0_i32_1 = arith.constant 0 : i32
    return %c0_i32, %c0_i32_0 : i32, i32
  }
  func.func @transform_4(%arg0: i32) -> (i32, i32) {
    %c0_i32 = arith.constant 0 : i32
    %c0_i32_0 = arith.constant 0 : i32
    %c0_i32_1 = arith.constant 0 : i32
    return %c0_i32, %c0_i32_0 : i32, i32
  }
  func.func @transform_5(%arg0: i32) -> (i32, i32) {
    %c0_i32 = arith.constant 0 : i32
    %c0_i32_0 = arith.constant 0 : i32
    %c0_i32_1 = arith.constant 0 : i32
    return %c0_i32, %c0_i32_0 : i32, i32
  }
  func.func @transform_6(%arg0: i32) -> (i32, i32) {
    %c0_i32 = arith.constant 0 : i32
    %c0_i32_0 = arith.constant 0 : i32
    %c0_i32_1 = arith.constant 0 : i32
    return %c0_i32, %c0_i32_0 : i32, i32
  }
  func.func @transform_7(%arg0: i32) -> (i32, i32) {
    %c0_i32 = arith.constant 0 : i32
    %c0_i32_0 = arith.constant 0 : i32
    return %arg0, %c0_i32 : i32, i32
  }
}

</mosaic_0001>

<bundles_post_ra>
// kernel: _policy_forward_padded.1
= control target key start
LH: loop header
LB: loop body
LE: loop exit
PB: predicated region body
PF: predicated region fallthrough
CT: control target
= control target key end

     0   :  { %12 = vsyncpa [#allocation3], 0  ;;  %s633_s0 = inlined_call_operand.vmem [shape: f32[8,2], index: 0, kind: input, shape index: {}]   ;;  %s634_s1 = inlined_call_operand.vmem [shape: f32[2,128], index: 1, kind: input, shape index: {}]   ;;  %s635_s2 = inlined_call_operand.vmem [shape: f32[1,128], index: 2, kind: input, shape index: {}]   ;;  %s636_s3 = inlined_call_operand.hbm [shape: bf16[128,128], index: 3, kind: input, shape index: {}]   ;;  %s637_s4 = inlined_call_operand.vmem [shape: f32[1,128], index: 4, kind: input, shape index: {}]   ;;  %s638_s5 = inlined_call_operand.hbm [shape: bf16[128,128], index: 5, kind: input, shape index: {}]   ;;  %s639_s6 = inlined_call_operand.vmem [shape: f32[1,128], index: 6, kind: input, shape index: {}]   ;;  %s640_s7 = inlined_call_operand.hbm [shape: f32[8,128], index: 7, kind: output, shape index: {}]  }
   0x1   :  { %13 = vsyncpa [#allocation6], 0 }
   0x2   :  { %14 = vsyncpa [#allocation4], 0  ;;  %s515_s24 = smov [#allocation2]   ;;  %s443_s28 = scalar_lea.hbm %s636_s3, 1024 }
   0x3   :  { %s26_s25 = sshll.u32 %s515_s24, 4  ;;  %p444_p0 = scmp.ne.s32.totalorder %s636_s3, %s443_s28  ;;  %s27_s25 = int_to_ptr.vmem [resolvable:$true] %s26_s25 }
   0x4   :  { %p447_p1 = scmp.lt.u32.totalorder %s443_s28, %s636_s3 }
   0x6   :  { %p449_p2 = pnand %p447_p1, %p444_p0 }
   0x8   :  { %452 = shalt.err (!%p449_p2)
}
   0x9   :  { %s453_s10 = scalar_lea.vmem %s27_s25, 1024  ;;  %p458_p4 = scmp.lt.s32.totalorder %s27_s25, %s27_s25 }
   0xa   :  { %p454_p3 = scmp.ne.s32.totalorder %s27_s25, %s453_s10  ;;  %p459_p5 = scmp.lt.s32.totalorder %s453_s10, %s453_s10 }
   0xc   :  { %p460_p6 = por %p459_p5, %p458_p4 }
   0xe   :  { %p461_p7 = pnand %p460_p6, %p454_p3 }
  0x10   :  { %464 = shalt.err (!%p461_p7)
}
  0x11   :  { %s516_s11 = smov 64   ;;  %s517_s12 = smov 4  }
  0x12   :  { %32 = dma.hbm_to_vmem [thread:$0]  %s636_s3, 1024, %s27_s25, [#allocation3], %s516_s11, %s516_s11, %s517_s12  }
  0x13   :  { %s518_s15 = smov [#allocation5]   ;;  %s465_s19 = scalar_lea.hbm %s638_s5, 1024 }
  0x14   :  { %s40_s16 = sshll.u32 %s518_s15, 4  ;;  %p466_p8 = scmp.ne.s32.totalorder %s638_s5, %s465_s19  ;;  %s41_s16 = int_to_ptr.vmem [resolvable:$true] %s40_s16 }
  0x15   :  { %p469_p9 = scmp.lt.u32.totalorder %s465_s19, %s638_s5 }
  0x17   :  { %p471_p10 = pnand %p469_p9, %p466_p8 }
  0x19   :  { %474 = shalt.err (!%p471_p10)
}
  0x1a   :  { %s475_s24 = scalar_lea.vmem %s41_s16, 1024  ;;  %p480_p12 = scmp.lt.s32.totalorder %s41_s16, %s41_s16 }
  0x1b   :  { %p476_p11 = scmp.ne.s32.totalorder %s41_s16, %s475_s24  ;;  %p481_p13 = scmp.lt.s32.totalorder %s475_s24, %s475_s24 }
  0x1d   :  { %p482_p0 = por %p481_p13, %p480_p12 }
  0x1f   :  { %p483_p1 = pnand %p482_p0, %p476_p11 }
  0x21   :  { %486 = shalt.err (!%p483_p1)
}
  0x22   :  { %46 = dma.hbm_to_vmem [thread:$0]  %s638_s5, 1024, %s41_s16, [#allocation6], %s516_s11, %s516_s11, %s517_s12  }
  0x23   :  { %509 = dma.done.wait [#allocation3], 1024  }
  0x24   :  { %510 = vsyncadd [#allocation3], 4294966272 }
  0x25   :  { %511 = dma.done.wait [#allocation6], 1024  }
  0x26   :  { %512 = vsyncadd [#allocation6], 4294966272  ;;  %v519_v0 = vmov 0   ;;  %v520_v1 = vmov 0.0   ;;  %v56_v2 = vld [vmem:[%s633_s0] sm:$0xff]  ;;  %v426_v4 = vld [vmem:[#allocation2 + $0x8] sm:$0xff]   ;;  %v63_v18 = vlaneseq }
  0x27   :  { %423 = vset.pattern.permute.xlu0 %v519_v0  ;;  %374 = vmatprep.subr.bf16.mxu0 %v520_v1  ;;  %v425_v3 = vld [vmem:[#allocation2] sm:$0xff]   ;;  %v521_v5 = vmov 1   ;;  %v427_v6 = vld [vmem:[#allocation2 + $0x10] sm:$0xff]   ;;  %v428_v7 = vld [vmem:[#allocation2 + $0x18] sm:$0xff]   ;;  %vm522_vm0 = vmmov 0  }
  0x28   :  { %394 = vmatprep.subr.bf16.mxu1 %v520_v1  ;;  %60 = vperm.xlu0 %423, %v56_v2   ;;  %v429_v8 = vld [vmem:[#allocation2 + $0x20] sm:$0xff]   ;;  %v434_v10 = vld [vmem:[#allocation5 + $0x8] sm:$0xff]   ;;  %v435_v12 = vld [vmem:[#allocation5 + $0x10] sm:$0xff]   ;;  %v64_v19 = vshrl.u32 %v63_v18, 7  ;;  %v313_v53 = vand.u32 127, %v63_v18 }
  0x29   :  { %375 = vmatpush3.bf16.msra.mxu0 %v425_v3  ;;  %390 = vmatprep.mubr.msk.bf16.mxu0 %vm522_vm0, %v520_v1  ;;  %v433_v9 = vld [vmem:[#allocation5] sm:$0xff]   ;;  %v430_v11 = vld [vmem:[#allocation2 + $0x28] sm:$0xff]   ;;  %v431_v13 = vld [vmem:[#allocation2 + $0x30] sm:$0xff]  }
  0x2a   :  { %376 = vmatprep.subr.bf16.mxu0 %v520_v1  ;;  %410 = vmatprep.mubr.msk.bf16.mxu1 %vm522_vm0, %v520_v1  ;;  %v436_v14 = vld [vmem:[#allocation5 + $0x18] sm:$0xff]   ;;  %v437_v16 = vld [vmem:[#allocation5 + $0x20] sm:$0xff]   ;;  %v438_v17 = vld [vmem:[#allocation5 + $0x28] sm:$0xff]   ;;  %v65_v20 = vsub.s32 0, %v64_v19  ;;  %v74_v21 = vsub.s32 1, %v64_v19  ;;  %vm318_vm1 = vcmp.ge.s32.totalorder %v313_v53, 1 }
  0x2b   :  { %395 = vmatpush3.bf16.msra.mxu1 %v433_v9  ;;  %v432_v15 = vld [vmem:[#allocation2 + $0x38] sm:$0xff]   ;;  %v57_v22 = vld [vmem:[%s634_s1] sm:$0x3]  ;;  %v439_v34 = vld [vmem:[#allocation5 + $0x30] sm:$0xff]  }
  0x2c   :  { %424 = vset.pattern.permute.xlu0 %v521_v5  ;;  %396 = vmatprep.subr.bf16.mxu1 %v520_v1  ;;  %v66_v24 = vrot.slane %v57_v22, %v65_v20  ;;  %v75_v25 = vrot.slane %v57_v22, %v74_v21  ;;  %v337_v29 = vld [vmem:[%s635_s2] ss:$0 sm:$0xff]  ;;  %v440_v35 = vld [vmem:[#allocation5 + $0x38] sm:$0xff]  }
  0x2d   :  { %69 = vperm.xlu0 %424, %v56_v2   ;;  %377 = vmatpush3.bf16.msra.mxu0 %v426_v4  ;;  %v338_v36 = vld [vmem:[%s637_s4] ss:$0 sm:$0xff]  ;;  %s523_s4 = smov [#allocation7]  }
  0x2e   :  { %378 = vmatprep.subr.bf16.mxu0 %v520_v1  ;;  %v347_v44 = vld [vmem:[%s639_s6] ss:$0 sm:$0xff]  ;;  %s327_s9 = sshll.u32 %s523_s4, 4  ;;  %s328_s9 = int_to_ptr.vmem [resolvable:$true] %s327_s9 }
  0x2f   :  { %397 = vmatpush3.bf16.msra.mxu1 %v434_v10  ;;  %s487_s10 = scalar_lea.vmem %s328_s9, 128  ;;  %p492_p3 = scmp.lt.s32.totalorder %s328_s9, %s328_s9 }
  0x30   :  { %398 = vmatprep.subr.bf16.mxu1 %v520_v1  ;;  %p488_p2 = scmp.ne.s32.totalorder %s328_s9, %s487_s10  ;;  %p493_p4 = scmp.lt.s32.totalorder %s487_s10, %s487_s10 }
  0x31   :  { %379 = vmatpush3.bf16.msra.mxu0 %v427_v6 }
  0x32   :  { %380 = vmatprep.subr.bf16.mxu0 %v520_v1  ;;  %p494_p5 = por %p493_p4, %p492_p3 }
  0x33   :  { %399 = vmatpush3.bf16.msra.mxu1 %v435_v12 }
  0x34   :  { %400 = vmatprep.subr.bf16.mxu1 %v520_v1  ;;  %p495_p6 = pnand %p494_p5, %p488_p2 }
  0x35   :  { %381 = vmatpush3.bf16.msra.mxu0 %v428_v7 }
  0x36   :  { %382 = vmatprep.subr.bf16.mxu0 %v520_v1 }
  0x37   :  { %401 = vmatpush3.bf16.msra.mxu1 %v436_v14 }
  0x38   :  { %402 = vmatprep.subr.bf16.mxu1 %v520_v1 }
  0x39   :  { %383 = vmatpush3.bf16.msra.mxu0 %v429_v8 }
  0x3a   :  { %384 = vmatprep.subr.bf16.mxu0 %v520_v1 }
  0x3b   :  { %403 = vmatpush3.bf16.msra.mxu1 %v437_v16 }
  0x3c   :  { %404 = vmatprep.subr.bf16.mxu1 %v520_v1 }
  0x3d   :  { %385 = vmatpush3.bf16.msra.mxu0 %v430_v11 }
  0x3e   :  { %386 = vmatprep.subr.bf16.mxu0 %v520_v1 }
  0x3f   :  { %405 = vmatpush3.bf16.msra.mxu1 %v438_v17 }
  0x40   :  { %406 = vmatprep.subr.bf16.mxu1 %v520_v1 }
  0x41   :  { %387 = vmatpush3.bf16.msra.mxu0 %v431_v13 }
  0x42   :  { %388 = vmatprep.subr.bf16.mxu0 %v520_v1 }
  0x43   :  { %407 = vmatpush3.bf16.msra.mxu1 %v439_v34 }
  0x44   :  { %408 = vmatprep.subr.bf16.mxu1 %v520_v1 }
  0x45   :  { %389 = vmatpush3.bf16.msra.mxu0 %v432_v15 }
  0x47   :  { %409 = vmatpush3.bf16.msra.mxu1 %v440_v35 }
  0xa7   :  { %v61_v23 = vpop.permute.xlu0 %60 }
  0xa8   :  { %v67_v27 = vmul.f32 %v66_v24, %v61_v23 }
  0xac   :  { %v70_v26 = vpop.permute.xlu0 %69 }
  0xad   :  { %v76_v28 = vmul.f32 %v75_v25, %v70_v26 }
  0xaf   :  { %v77_v30 = vadd.f32 %v76_v28, %v67_v27 }
  0xb1   :  { %v85_v31 = vadd.f32 %v337_v29, %v77_v30 }
  0xb3   :  { %v86_v32 = vmax.f32 %v85_v31, 0.0 }
  0xb5   :  { %v87_v33 = vpack.c.bf16 %v86_v32, %v86_v32 }
  0xb7   :  { %391 = vmatmul.mubr.bf16.vlgmr.msra.gmra.mrb[0].mxu0 %v87_v33 }
 0x18a   :  { %v193_v37 = vpop.f32.mrb[0].mxu0 }
 0x18b   :  { %v194_v38 = vadd.f32 %v338_v36, %v193_v37  ;;  %v392_v39 = vpop.f32.mrb[1].mxu0 }
 0x18c   :  { %v196_v40 = vpop.f32.mrb[2].mxu0 }
 0x18d   :  { %v199_v41 = vmax.f32 %v194_v38, 0.0  ;;  %v393_v42 = vpop.f32.mrb[3].mxu0 }
 0x18f   :  { %v200_v43 = vpack.c.bf16 %v199_v41, %v199_v41 }
 0x191   :  { %411 = vmatmul.mubr.bf16.vlgmr.msra.gmra.mrb[0].mxu1 %v200_v43 }
 0x264   :  { %v306_v45 = vpop.f32.mrb[0].mxu1 }
 0x265   :  { %v307_v46 = vadd.f32 %v347_v44, %v306_v45  ;;  %v412_v47 = vpop.f32.mrb[1].mxu1 }
 0x266   :  { %v309_v48 = vpop.f32.mrb[2].mxu1 }
 0x267   :  { %v314_v49 = vmax.f32 %v307_v46, -20.0  ;;  %v413_v50 = vpop.f32.mrb[3].mxu1 }
 0x269   :  { %v315_v51 = vmin.f32 %v314_v49, 2.0 }
 0x26b   :  { %v316_v52 = vmul.f32 1.442695, %v315_v51 }
 0x26d   :  { %441 = vpow2.f32 %v316_v52 }
 0x277   :  { %v442_v54 = vpop.eup %441 }
 0x278   :  { %v319_v55 = vsel %vm318_vm1, %v442_v54, %v307_v46 }
 0x279   :  { %320 = vst [vmem:[#allocation7] sm:$0xff] %v319_v55 }
 0x27a   :  { %498 = shalt.err (!%p495_p6)
}
 0x27b   :  { %s499_s12 = scalar_lea.hbm %s640_s7, 128 }
 0x27c   :  { %p500_p7 = scmp.ne.s32.totalorder %s640_s7, %s499_s12  ;;  %p503_p8 = scmp.lt.u32.totalorder %s499_s12, %s640_s7 }
 0x27e   :  { %p505_p9 = pnand %p503_p8, %p500_p7 }
 0x280   :  { %508 = shalt.err (!%p505_p9)
}
 0x281   :  { %330 = dma.vmem_to_hbm [thread:$0]  %s328_s9, 128, %s640_s7, [#allocation4]  }
 0x282   :  { %513 = dma.done.wait [#allocation4], 128  }
 0x283   :  { %514 = vsyncadd [#allocation4], 4294967168 }
 0x284   :  { %334 = vsyncpa [#allocation3], 1 }
 0x285   :  { %335 = vsyncpa [#allocation6], 1 }
 0x286   :  { %336 = vsyncpa [#allocation4], 1 }

</bundles_post_ra>
